<compile_context>
chip_gen: v7x
topology: tpu7x:2x2x1
jax: 0.10.0
libtpu: 0.0.40
codegen_flags: <defaults>
</compile_context>

<pallas_src>
import functools
import math

import jax
import jax.numpy as jnp
from jax.experimental import pallas as pl
from jax.experimental.pallas import tpu as pltpu


_LN_EPS = 1e-12                 # espnet LayerNorm default (torch.nn.LayerNorm(eps=1e-12))
_ROW_TILE = 256                 # row tile for projection / FFN kernels
_Q_TILE = 256                   # flash attention query tile
_KV_TILE = 512                  # flash attention key/value tile
_COMPUTE_DTYPE = jnp.bfloat16   # MXU operand dtype (f32 accumulation everywhere)
_VMEM_LIMIT_BYTES = 48 * 1024 * 1024   # explicit scoped-VMEM budget (above 16/32 MiB defaults)
_NEG_INF = -1e30


def _cparams(*sems):
    return pltpu.CompilerParams(dimension_semantics=tuple(sems),
                                vmem_limit_bytes=_VMEM_LIMIT_BYTES)


def _resident(shape):
    # Constant-index (grid-invariant) operand: single-buffered, fetched once.
    n = len(shape)
    return pl.BlockSpec(shape, lambda *args, _n=n: (0,) * _n,
                        pipeline_mode=pl.Buffered(1))


# ----------------------------------------------------------------------------
# Kernel bodies
# ----------------------------------------------------------------------------

def _layer_norm(x, gamma, beta, eps):
    x = x.astype(jnp.float32)
    mean = jnp.mean(x, axis=-1, keepdims=True)
    c = x - mean
    var = jnp.mean(c * c, axis=-1, keepdims=True)
    return (c * jax.lax.rsqrt(var + eps)) * gamma + beta


def _ln_qkv_kernel(x_ref, g_ref, b_ref, wq_ref, bq_ref, wkv_ref, bkv_ref,
                   oq_ref, ok_ref, ov_ref, *, eps):
    # q = LN(x) @ Wq + bq   (softmax scale pre-folded into Wq/bq)
    # kv = LN(x) @ [Wk | Wv] + [bk | bv]
    _, num_heads, _, dk = oq_ref.shape
    d = num_heads * dk
    xn = _layer_norm(x_ref[0], g_ref[...], b_ref[...], eps).astype(wq_ref.dtype)
    q = jnp.dot(xn, wq_ref[...], preferred_element_type=jnp.float32) + bq_ref[...]
    kv = jnp.dot(xn, wkv_ref[...], preferred_element_type=jnp.float32) + bkv_ref[...]
    # Head split done once here (store head-major); the flash kernel then gets clean
    # (block, dk) tiles straight from its BlockSpec DMA with no in-kernel relayout.
    for h in range(num_heads):
        sl = slice(h * dk, (h + 1) * dk)
        oq_ref[0, h] = q[:, sl].astype(oq_ref.dtype)
        ok_ref[0, h] = kv[:, sl].astype(ok_ref.dtype)
        ov_ref[0, h] = kv[:, d + h * dk:d + (h + 1) * dk].astype(ov_ref.dtype)


def _kv_mem_kernel(mem_ref, wkv_ref, bkv_ref, ok_ref, ov_ref):
    # Cross-attention K/V projection of the (un-normalized) encoder memory.
    _, num_heads, _, dk = ok_ref.shape
    d = num_heads * dk
    m = mem_ref[0].astype(wkv_ref.dtype)
    kv = jnp.dot(m, wkv_ref[...], preferred_element_type=jnp.float32) + bkv_ref[...]
    for h in range(num_heads):
        ok_ref[0, h] = kv[:, h * dk:(h + 1) * dk].astype(ok_ref.dtype)
        ov_ref[0, h] = kv[:, d + h * dk:d + (h + 1) * dk].astype(ov_ref.dtype)


def _flash_kernel(q_ref, k_ref, v_ref, mask_ref, o_ref, m_scr, l_scr, acc_scr,
                  *, causal, block_q, block_kv, kv_len):
    # One (batch, head, q-tile) triple; online softmax over the kv-tile axis.
    qi = pl.program_id(2)
    ki = pl.program_id(3)

    @pl.when(ki == 0)
    def _():
        m_scr[...] = jnp.full_like(m_scr, _NEG_INF)
        l_scr[...] = jnp.zeros_like(l_scr)
        acc_scr[...] = jnp.zeros_like(acc_scr)

    def _step():
        q = q_ref[0, 0]                                   # (block_q, dk) bf16
        k = k_ref[0, 0]                                   # (block_kv, dk) bf16
        v = v_ref[0, 0]
        s = jax.lax.dot_general(q, k, (((1,), (1,)), ((), ())),
                                preferred_element_type=jnp.float32)  # (bq, bk)
        mask = mask_ref[0] != 0                           # (1, block_kv) key-pad mask
        if kv_len % block_kv != 0:                        # guard padded tail kv tile
            kpos = ki * block_kv + jax.lax.broadcasted_iota(jnp.int32, (1, block_kv), 1)
            mask = jnp.logical_and(mask, kpos < kv_len)
        if causal:                                        # causal mask generated in-kernel
            qpos = qi * block_q + jax.lax.broadcasted_iota(
                jnp.int32, (block_q, block_kv), 0)
            kpos2 = ki * block_kv + jax.lax.broadcasted_iota(
                jnp.int32, (block_q, block_kv), 1)
            mask = jnp.logical_and(mask, kpos2 <= qpos)
        s = jnp.where(mask, s, _NEG_INF)
        m_prev = m_scr[...]
        m_new = jnp.maximum(m_prev, jnp.max(s, axis=-1, keepdims=True))
        alpha = jnp.exp(m_prev - m_new)
        # post-exp zero keeps fully-masked (q-row, kv-tile) combinations exact
        p = jnp.where(mask, jnp.exp(s - m_new), 0.0)
        l_scr[...] = alpha * l_scr[...] + jnp.sum(p, axis=-1, keepdims=True)
        acc_scr[...] = alpha * acc_scr[...] + jnp.dot(
            p.astype(v.dtype), v, preferred_element_type=jnp.float32)
        m_scr[...] = m_new

    if causal:
        # skip compute for kv tiles fully above the diagonal
        @pl.when(ki * block_kv < (qi + 1) * block_q)
        def _():
            _step()
    else:
        _step()

    @pl.when(ki == pl.num_programs(3) - 1)
    def _():
        l_safe = jnp.maximum(l_scr[...], 1e-30)           # fully-masked rows -> 0 (espnet semantics)
        o_ref[0, 0] = (acc_scr[...] * pl.reciprocal(l_safe, approx=True)).astype(o_ref.dtype)


def _sum_heads(ctx):
    # (H, t, d) -> (t, d), H is static and small
    y = ctx[0]
    for h in range(1, ctx.shape[0]):
        y = y + ctx[h]
    return y


def _attn_out_ln_q_kernel(sa_ref, wo_ref, bo_ref, res_ref, g_ref, b_ref,
                          wq_ref, bq_ref, x_out_ref, q_out_ref, *, eps):
    # x1 = residual + sum_h( attn_h @ Wo_h ) + bo ;  q_cross = LN2(x1) @ Wq_src + bq_src
    _, num_heads, _, dk = q_out_ref.shape
    ctx = jax.lax.dot_general(sa_ref[0], wo_ref[...],
                              (((2,), (1,)), ((0,), (0,))),
                              preferred_element_type=jnp.float32)     # (H, t, d)
    y = _sum_heads(ctx) + bo_ref[...] + res_ref[0].astype(jnp.float32)
    x_out_ref[0] = y.astype(x_out_ref.dtype)
    xn = _layer_norm(y, g_ref[...], b_ref[...], eps).astype(wq_ref.dtype)
    q = jnp.dot(xn, wq_ref[...], preferred_element_type=jnp.float32) + bq_ref[...]
    for h in range(num_heads):
        q_out_ref[0, h] = q[:, h * dk:(h + 1) * dk].astype(q_out_ref.dtype)


def _attn_out_ffn_kernel(ca_ref, wo_ref, bo_ref, res_ref, g_ref, b_ref,
                         w1_ref, b1_ref, w2_ref, b2_ref, o_ref, *, eps):
    # y  = residual + sum_h( attn_h @ Wo_h ) + bo
    # out = y + relu(LN3(y) @ W1 + b1) @ W2 + b2
    ctx = jax.lax.dot_general(ca_ref[0], wo_ref[...],
                              (((2,), (1,)), ((0,), (0,))),
                              preferred_element_type=jnp.float32)
    y = _sum_heads(ctx) + bo_ref[...] + res_ref[0].astype(jnp.float32)
    xn = _layer_norm(y, g_ref[...], b_ref[...], eps).astype(w1_ref.dtype)
    hid = jnp.dot(xn, w1_ref[...], preferred_element_type=jnp.float32) + b1_ref[...]
    hid = jnp.maximum(hid, 0.0).astype(w2_ref.dtype)
    z = jnp.dot(hid, w2_ref[...], preferred_element_type=jnp.float32) + b2_ref[...]
    o_ref[0] = (y + z).astype(o_ref.dtype)


# ----------------------------------------------------------------------------
# pallas_call wrappers
# ----------------------------------------------------------------------------

def ln_qkv_proj(x, g, b, wq, bq, wkv, bkv, num_heads):
    B, T, d = x.shape
    dk = d // num_heads
    tt = min(T, _ROW_TILE)
    grid = (B, pl.cdiv(T, tt))
    head_shape = jax.ShapeDtypeStruct((B, num_heads, T, dk), _COMPUTE_DTYPE)
    head_spec = pl.BlockSpec((1, num_heads, tt, dk), lambda bi, ti: (bi, 0, ti, 0))
    return pl.pallas_call(
        functools.partial(_ln_qkv_kernel, eps=_LN_EPS),
        out_shape=(head_shape, head_shape, head_shape),
        grid=grid,
        in_specs=[
            pl.BlockSpec((1, tt, d), lambda bi, ti: (bi, ti, 0)),
            _resident((1, d)), _resident((1, d)),
            _resident((d, d)), _resident((1, d)),
            _resident((d, 2 * d)), _resident((1, 2 * d)),
        ],
        out_specs=(head_spec, head_spec, head_spec),
        compiler_params=_cparams("parallel", "parallel"),
    )(x, g, b, wq, bq, wkv, bkv)


def kv_proj(memory, wkv, bkv, num_heads):
    B, Tk, d = memory.shape
    dk = d // num_heads
    tt = min(Tk, _ROW_TILE)
    grid = (B, pl.cdiv(Tk, tt))
    head_shape = jax.ShapeDtypeStruct((B, num_heads, Tk, dk), _COMPUTE_DTYPE)
    head_spec = pl.BlockSpec((1, num_heads, tt, dk), lambda bi, ti: (bi, 0, ti, 0))
    return pl.pallas_call(
        _kv_mem_kernel,
        out_shape=(head_shape, head_shape),
        grid=grid,
        in_specs=[
            pl.BlockSpec((1, tt, d), lambda bi, ti: (bi, ti, 0)),
            _resident((d, 2 * d)), _resident((1, 2 * d)),
        ],
        out_specs=(head_spec, head_spec),
        compiler_params=_cparams("parallel", "parallel"),
    )(memory, wkv, bkv)


def flash_attention(q, k, v, key_mask_i8, *, causal):
    B, H, Tq, dk = q.shape
    Tk = k.shape[2]
    bq = min(Tq, _Q_TILE)
    bk = min(Tk, _KV_TILE)
    grid = (B, H, pl.cdiv(Tq, bq), pl.cdiv(Tk, bk))
    return pl.pallas_call(
        functools.partial(_flash_kernel, causal=causal,
                          block_q=bq, block_kv=bk, kv_len=Tk),
        out_shape=jax.ShapeDtypeStruct((B, H, Tq, dk), _COMPUTE_DTYPE),
        grid=grid,
        in_specs=[
            pl.BlockSpec((1, 1, bq, dk), lambda bi, hi, qi, ki: (bi, hi, qi, 0)),
            pl.BlockSpec((1, 1, bk, dk), lambda bi, hi, qi, ki: (bi, hi, ki, 0)),
            pl.BlockSpec((1, 1, bk, dk), lambda bi, hi, qi, ki: (bi, hi, ki, 0)),
            pl.BlockSpec((1, 1, bk), lambda bi, hi, qi, ki: (bi, 0, ki)),
        ],
        out_specs=pl.BlockSpec((1, 1, bq, dk), lambda bi, hi, qi, ki: (bi, hi, qi, 0)),
        scratch_shapes=[pltpu.VMEM((bq, 1), jnp.float32),
                        pltpu.VMEM((bq, 1), jnp.float32),
                        pltpu.VMEM((bq, dk), jnp.float32)],
        compiler_params=_cparams("parallel", "parallel", "parallel", "arbitrary"),
    )(q, k, v, key_mask_i8)


def attn_out_residual_ln_q(sa, wo3, bo, residual, g, b, wq, bq):
    B, H, T, dk = sa.shape
    d = H * dk
    tt = min(T, _ROW_TILE)
    grid = (B, pl.cdiv(T, tt))
    head_spec = pl.BlockSpec((1, H, tt, dk), lambda bi, ti: (bi, 0, ti, 0))
    row_spec = pl.BlockSpec((1, tt, d), lambda bi, ti: (bi, ti, 0))
    return pl.pallas_call(
        functools.partial(_attn_out_ln_q_kernel, eps=_LN_EPS),
        out_shape=(jax.ShapeDtypeStruct((B, T, d), jnp.float32),
                   jax.ShapeDtypeStruct((B, H, T, dk), _COMPUTE_DTYPE)),
        grid=grid,
        in_specs=[
            head_spec,
            _resident((H, dk, d)), _resident((1, d)),
            row_spec,
            _resident((1, d)), _resident((1, d)),
            _resident((d, d)), _resident((1, d)),
        ],
        out_specs=(row_spec, head_spec),
        compiler_params=_cparams("parallel", "parallel"),
    )(sa, wo3, bo, residual, g, b, wq, bq)


def attn_out_residual_ffn(ca, wo3, bo, residual, g, b, w1, b1, w2, b2):
    B, H, T, dk = ca.shape
    d = H * dk
    ff = w1.shape[1]
    tt = min(T, _ROW_TILE)
    grid = (B, pl.cdiv(T, tt))
    head_spec = pl.BlockSpec((1, H, tt, dk), lambda bi, ti: (bi, 0, ti, 0))
    row_spec = pl.BlockSpec((1, tt, d), lambda bi, ti: (bi, ti, 0))
    return pl.pallas_call(
        functools.partial(_attn_out_ffn_kernel, eps=_LN_EPS),
        out_shape=jax.ShapeDtypeStruct((B, T, d), jnp.float32),
        grid=grid,
        in_specs=[
            head_spec,
            _resident((H, dk, d)), _resident((1, d)),
            row_spec,
            _resident((1, d)), _resident((1, d)),
            _resident((d, ff)), _resident((1, ff)),
            _resident((ff, d)), _resident((1, d)),
        ],
        out_specs=row_spec,
        compiler_params=_cparams("parallel", "parallel"),
    )(ca, wo3, bo, residual, g, b, w1, b1, w2, b2)


# ----------------------------------------------------------------------------
# Module composition
# ----------------------------------------------------------------------------

def decoder_layer(x, tgt_key_mask_i8, memory, memory_mask_i8, p, num_heads):
    # 1. LN1 + fused Q/K/V projection (head-major bf16 outputs)
    q, k, v = ln_qkv_proj(x, p["norm1_g"], p["norm1_b"],
                          p["self_wq"], p["self_bq"], p["self_wkv"], p["self_bkv"],
                          num_heads)
    # 2. causal flash self-attention (causal mask generated in-kernel)
    sa = flash_attention(q, k, v, tgt_key_mask_i8, causal=True)
    # 3. self out-proj + residual, fused with LN2 + cross-attention Q projection
    x, qc = attn_out_residual_ln_q(sa, p["self_wo3"], p["self_bo"], x,
                                   p["norm2_g"], p["norm2_b"],
                                   p["src_wq"], p["src_bq"])
    # 4. K/V projection of the encoder memory (memory is not layer-normed in espnet)
    km, vm = kv_proj(memory, p["src_wkv"], p["src_bkv"], num_heads)
    # 5. flash cross-attention with the memory padding mask
    ca = flash_attention(qc, km, vm, memory_mask_i8, causal=False)
    # 6. cross out-proj + residual + LN3 + FFN + residual (fused)
    x = attn_out_residual_ffn(ca, p["src_wo3"], p["src_bo"], x,
                              p["norm3_g"], p["norm3_b"],
                              p["ffn_w1"], p["ffn_b1"], p["ffn_w2"], p["ffn_b2"])
    # Adapter is None (use_adapter=False) -> nothing else to do.
    return x


def decoder_forward(tgt, tgt_mask, memory, memory_mask, params, num_heads,
                    num_blocks_share=1):
    # espnet convention: tgt_mask = key_padding_mask(B,1,T) & subsequent_mask(T,T).
    # The causal part is regenerated in-kernel; only the key-padding row is shipped.
    B, T, _ = tgt.shape
    tgt_mask_i8 = tgt_mask.astype(jnp.int8)
    if tgt_mask_i8.ndim == 3 and tgt_mask_i8.shape[1] > 1:
        tgt_key_mask_i8 = jnp.max(tgt_mask_i8, axis=1, keepdims=True)   # (B, 1, T)
    else:
        tgt_key_mask_i8 = tgt_mask_i8.reshape(B, 1, T)
    memory_mask_i8 = memory_mask.astype(jnp.int8)                       # (B, 1, Tk)

    x = tgt
    for layer_p in params["layers"]:
        for _ in range(num_blocks_share):
            x = decoder_layer(x, tgt_key_mask_i8, memory, memory_mask_i8,
                              layer_p, num_heads)
    return x


# ----------------------------------------------------------------------------
# Deterministic parameter initialization (weights bf16, biases / LN params f32)
# ----------------------------------------------------------------------------

def _init_w(key, din, dout, scale=0.02):
    return jax.random.normal(key, (din, dout), jnp.float32) * scale


def init_decoder_params(key, d_model, linear_units, num_blocks, attention_heads,
                        num_blocks_share=1):
    H = attention_heads
    dk = d_model // H
    q_scale = 1.0 / math.sqrt(dk)     # softmax scale folded into the Q projection
    layers = []
    for _ in range(max(1, num_blocks // num_blocks_share)):
        key, *ks = jax.random.split(key, 11)
        wo_self = _init_w(ks[3], d_model, d_model)
        wo_src = _init_w(ks[7], d_model, d_model)
        layer = dict(
            # self-attention (scale pre-folded into Wq; a non-zero q bias would be scaled too)
            self_wq=(_init_w(ks[0], d_model, d_model) * q_scale).astype(_COMPUTE_DTYPE),
            self_bq=jnp.zeros((1, d_model), jnp.float32) * q_scale,
            self_wkv=jnp.concatenate([_init_w(ks[1], d_model, d_model),
                                      _init_w(ks[2], d_model, d_model)],
                                     axis=1).astype(_COMPUTE_DTYPE),
            self_bkv=jnp.zeros((1, 2 * d_model), jnp.float32),
            # output projection stored head-major (H, dk, d) for the batched out-proj dot
            self_wo3=wo_self.reshape(H, dk, d_model).astype(_COMPUTE_DTYPE),
            self_bo=jnp.zeros((1, d_model), jnp.float32),
            # cross-attention
            src_wq=(_init_w(ks[4], d_model, d_model) * q_scale).astype(_COMPUTE_DTYPE),
            src_bq=jnp.zeros((1, d_model), jnp.float32) * q_scale,
            src_wkv=jnp.concatenate([_init_w(ks[5], d_model, d_model),
                                     _init_w(ks[6], d_model, d_model)],
                                    axis=1).astype(_COMPUTE_DTYPE),
            src_bkv=jnp.zeros((1, 2 * d_model), jnp.float32),
            src_wo3=wo_src.reshape(H, dk, d_model).astype(_COMPUTE_DTYPE),
            src_bo=jnp.zeros((1, d_model), jnp.float32),
            # position-wise feed forward
            ffn_w1=_init_w(ks[8], d_model, linear_units).astype(_COMPUTE_DTYPE),
            ffn_b1=jnp.zeros((1, linear_units), jnp.float32),
            ffn_w2=_init_w(ks[9], linear_units, d_model).astype(_COMPUTE_DTYPE),
            ffn_b2=jnp.zeros((1, d_model), jnp.float32),
            # layer norms
            norm1_g=jnp.ones((1, d_model), jnp.float32),
            norm1_b=jnp.zeros((1, d_model), jnp.float32),
            norm2_g=jnp.ones((1, d_model), jnp.float32),
            norm2_b=jnp.zeros((1, d_model), jnp.float32),
            norm3_g=jnp.ones((1, d_model), jnp.float32),
            norm3_b=jnp.zeros((1, d_model), jnp.float32),
        )
        layers.append(layer)
    return dict(layers=layers)


# ----------------------------------------------------------------------------
# Demo
# ----------------------------------------------------------------------------

if __name__ == "__main__":
    B, TQ, TK = 2, 8, 16        # batch, target len, memory len
    D, H, FF = 32, 4, 64        # d_model, attention_heads, linear_units
    NUM_BLOCKS = 2              # num_blocks (small for the demo), num_blocks_share=1

    key = jax.random.PRNGKey(0)
    k_tgt, k_mem, k_par = jax.random.split(key, 3)
    tgt = jax.random.normal(k_tgt, (B, TQ, D), jnp.float32)          # embedded target
    memory = jax.random.normal(k_mem, (B, TK, D), jnp.float32)       # encoder output

    # causal (subsequent) & padding target mask: (B, TQ, TQ)
    tgt_mask = jnp.broadcast_to(jnp.tril(jnp.ones((TQ, TQ), jnp.bool_))[None],
                                (B, TQ, TQ))
    # encoder memory mask: (B, 1, TK) with one padded sequence
    mem_lens = jnp.array([TK, 12])
    memory_mask = jnp.arange(TK)[None, None, :] < mem_lens[:, None, None]

    params = init_decoder_params(k_par, D, FF, NUM_BLOCKS, H, num_blocks_share=1)
    out = decoder_forward(tgt, tgt_mask, memory, memory_mask, params, H,
                          num_blocks_share=1)
    out = jax.block_until_ready(out)
    assert out.shape == (B, TQ, D) and out.dtype == jnp.float32
    assert bool(jnp.all(jnp.isfinite(out)))
    print("KERNEL_OK")
</pallas_src>

<mosaic_0001>
module attributes {stable_mosaic.version = 11 : i64} {
  func.func @_ln_qkv_kernel(%arg0: i32, %arg1: i32, %arg2: memref<1x8x32xf32, #tpu.memory_space<vmem>>, %arg3: memref<1x32xf32, #tpu.memory_space<vmem>>, %arg4: memref<1x32xf32, #tpu.memory_space<vmem>>, %arg5: memref<32x32xbf16, #tpu.memory_space<vmem>>, %arg6: memref<1x32xf32, #tpu.memory_space<vmem>>, %arg7: memref<32x64xbf16, #tpu.memory_space<vmem>>, %arg8: memref<1x64xf32, #tpu.memory_space<vmem>>, %arg9: memref<1x4x8x8xbf16, #tpu.memory_space<vmem>>, %arg10: memref<1x4x8x8xbf16, #tpu.memory_space<vmem>>, %arg11: memref<1x4x8x8xbf16, #tpu.memory_space<vmem>>) attributes {dimension_semantics = [#tpu.dimension_semantics<parallel>, #tpu.dimension_semantics<parallel>], iteration_bounds = array<i64: 2, 1>, scalar_prefetch = 0 : i64, scratch_operands = 0 : i64, tpu.core_type = #tpu.core_type<tc>, window_params = [{transform_indices = @transform_0, window_bounds = array<i64: 1, 8, 32>}, {pipeline_mode = #tpu.pipeline_mode<synchronous>, transform_indices = @transform_1, window_bounds = array<i64: 1, 32>}, {pipeline_mode = #tpu.pipeline_mode<synchronous>, transform_indices = @transform_2, window_bounds = array<i64: 1, 32>}, {pipeline_mode = #tpu.pipeline_mode<synchronous>, transform_indices = @transform_3, window_bounds = array<i64: 32, 32>}, {pipeline_mode = #tpu.pipeline_mode<synchronous>, transform_indices = @transform_4, window_bounds = array<i64: 1, 32>}, {pipeline_mode = #tpu.pipeline_mode<synchronous>, transform_indices = @transform_5, window_bounds = array<i64: 32, 64>}, {pipeline_mode = #tpu.pipeline_mode<synchronous>, transform_indices = @transform_6, window_bounds = array<i64: 1, 64>}, {transform_indices = @transform_7, window_bounds = array<i64: 1, 4, 8, 8>}, {transform_indices = @transform_8, window_bounds = array<i64: 1, 4, 8, 8>}, {transform_indices = @transform_9, window_bounds = array<i64: 1, 4, 8, 8>}]} {
    %c0 = arith.constant 0 : index
    %c0_0 = arith.constant 0 : index
    %c0_1 = arith.constant 0 : index
    %0 = vector.load %arg2[%c0, %c0_0, %c0_1] : memref<1x8x32xf32, #tpu.memory_space<vmem>>, vector<1x8x32xf32>
    %1 = vector.shape_cast %0 : vector<1x8x32xf32> to vector<8x32xf32>
    %c0_2 = arith.constant 0 : index
    %c0_3 = arith.constant 0 : index
    %2 = vector.load %arg3[%c0_2, %c0_3] : memref<1x32xf32, #tpu.memory_space<vmem>>, vector<1x32xf32>
    %c0_4 = arith.constant 0 : index
    %c0_5 = arith.constant 0 : index
    %3 = vector.load %arg4[%c0_4, %c0_5] : memref<1x32xf32, #tpu.memory_space<vmem>>, vector<1x32xf32>
    %cst = arith.constant dense<0.000000e+00> : vector<8xf32>
    %4 = vector.multi_reduction <add>, %1, %cst [1] : vector<8x32xf32> to vector<8xf32>
    %5 = vector.shape_cast %4 : vector<8xf32> to vector<8x1xf32>
    %cst_6 = arith.constant 3.200000e+01 : f32
    %6 = vector.broadcast %cst_6 : f32 to vector<8x1xf32>
    %7 = arith.divf %5, %6 : vector<8x1xf32>
    %8 = vector.broadcast %7 : vector<8x1xf32> to vector<8x32xf32>
    %9 = arith.subf %1, %8 : vector<8x32xf32>
    %10 = arith.mulf %9, %9 : vector<8x32xf32>
    %cst_7 = arith.constant dense<0.000000e+00> : vector<8xf32>
    %11 = vector.multi_reduction <add>, %10, %cst_7 [1] : vector<8x32xf32> to vector<8xf32>
    %12 = vector.shape_cast %11 : vector<8xf32> to vector<8x1xf32>
    %cst_8 = arith.constant 3.200000e+01 : f32
    %13 = vector.broadcast %cst_8 : f32 to vector<8x1xf32>
    %14 = arith.divf %12, %13 : vector<8x1xf32>
    %cst_9 = arith.constant 9.99999996E-13 : f32
    %15 = vector.broadcast %cst_9 : f32 to vector<8x1xf32>
    %16 = arith.addf %14, %15 : vector<8x1xf32>
    %17 = math.rsqrt %16 : vector<8x1xf32>
    %18 = vector.broadcast %17 : vector<8x1xf32> to vector<8x32xf32>
    %19 = arith.mulf %9, %18 : vector<8x32xf32>
    %20 = vector.broadcast %2 : vector<1x32xf32> to vector<8x32xf32>
    %21 = arith.mulf %19, %20 : vector<8x32xf32>
    %22 = vector.broadcast %3 : vector<1x32xf32> to vector<8x32xf32>
    %23 = arith.addf %21, %22 : vector<8x32xf32>
    %24 = arith.truncf %23 : vector<8x32xf32> to vector<8x32xbf16>
    %c0_10 = arith.constant 0 : index
    %c0_11 = arith.constant 0 : index
    %25 = vector.load %arg5[%c0_10, %c0_11] : memref<32x32xbf16, #tpu.memory_space<vmem>>, vector<32x32xbf16>
    %cst_12 = arith.constant dense<0.000000e+00> : vector<8x32xf32>
    %26 = tpu.matmul %24, %25, %cst_12 {dimension_numbers = #tpu.dot_dimension_numbers<[1], [0], [0], [1], [0, 0, 1, 1], [], []>} : vector<8x32xbf16>, vector<32x32xbf16>, vector<8x32xf32> -> vector<8x32xf32>
    %c0_13 = arith.constant 0 : index
    %c0_14 = arith.constant 0 : index
    %27 = vector.load %arg6[%c0_13, %c0_14] : memref<1x32xf32, #tpu.memory_space<vmem>>, vector<1x32xf32>
    %28 = vector.broadcast %27 : vector<1x32xf32> to vector<8x32xf32>
    %29 = arith.addf %26, %28 : vector<8x32xf32>
    %c0_15 = arith.constant 0 : index
    %c0_16 = arith.constant 0 : index
    %30 = vector.load %arg7[%c0_15, %c0_16] : memref<32x64xbf16, #tpu.memory_space<vmem>>, vector<32x64xbf16>
    %cst_17 = arith.constant dense<0.000000e+00> : vector<8x64xf32>
    %31 = tpu.matmul %24, %30, %cst_17 {dimension_numbers = #tpu.dot_dimension_numbers<[1], [0], [0], [1], [0, 0, 1, 1], [], []>} : vector<8x32xbf16>, vector<32x64xbf16>, vector<8x64xf32> -> vector<8x64xf32>
    %c0_18 = arith.constant 0 : index
    %c0_19 = arith.constant 0 : index
    %32 = vector.load %arg8[%c0_18, %c0_19] : memref<1x64xf32, #tpu.memory_space<vmem>>, vector<1x64xf32>
    %33 = vector.broadcast %32 : vector<1x64xf32> to vector<8x64xf32>
    %34 = arith.addf %31, %33 : vector<8x64xf32>
    %35 = vector.extract_strided_slice %29 {offsets = [0, 0], sizes = [8, 8], strides = [1, 1]} : vector<8x32xf32> to vector<8x8xf32>
    %36 = arith.truncf %35 : vector<8x8xf32> to vector<8x8xbf16>
    %c0_20 = arith.constant 0 : index
    %c0_21 = arith.constant 0 : index
    %c0_22 = arith.constant 0 : index
    %c0_23 = arith.constant 0 : index
    %37 = vector.load %arg9[%c0_20, %c0_21, %c0_22, %c0_23] : memref<1x4x8x8xbf16, #tpu.memory_space<vmem>>, vector<1x1x8x8xbf16>
    %38 = vector.shape_cast %37 : vector<1x1x8x8xbf16> to vector<8x8xbf16>
    %39 = vector.shape_cast %36 : vector<8x8xbf16> to vector<1x1x8x8xbf16>
    tpu.vector_store %arg9[%c0_20, %c0_21, %c0_22, %c0_23], %39 {strides = array<i32>} : memref<1x4x8x8xbf16, #tpu.memory_space<vmem>>, vector<1x1x8x8xbf16>,
    %40 = vector.extract_strided_slice %34 {offsets = [0, 0], sizes = [8, 8], strides = [1, 1]} : vector<8x64xf32> to vector<8x8xf32>
    %41 = arith.truncf %40 : vector<8x8xf32> to vector<8x8xbf16>
    %c0_24 = arith.constant 0 : index
    %c0_25 = arith.constant 0 : index
    %c0_26 = arith.constant 0 : index
    %c0_27 = arith.constant 0 : index
    %42 = vector.load %arg10[%c0_24, %c0_25, %c0_26, %c0_27] : memref<1x4x8x8xbf16, #tpu.memory_space<vmem>>, vector<1x1x8x8xbf16>
    %43 = vector.shape_cast %42 : vector<1x1x8x8xbf16> to vector<8x8xbf16>
    %44 = vector.shape_cast %41 : vector<8x8xbf16> to vector<1x1x8x8xbf16>
    tpu.vector_store %arg10[%c0_24, %c0_25, %c0_26, %c0_27], %44 {strides = array<i32>} : memref<1x4x8x8xbf16, #tpu.memory_space<vmem>>, vector<1x1x8x8xbf16>,
    %45 = vector.extract_strided_slice %34 {offsets = [0, 32], sizes = [8, 8], strides = [1, 1]} : vector<8x64xf32> to vector<8x8xf32>
    %46 = arith.truncf %45 : vector<8x8xf32> to vector<8x8xbf16>
    %c0_28 = arith.constant 0 : index
    %c0_29 = arith.constant 0 : index
    %c0_30 = arith.constant 0 : index
    %c0_31 = arith.constant 0 : index
    %47 = vector.load %arg11[%c0_28, %c0_29, %c0_30, %c0_31] : memref<1x4x8x8xbf16, #tpu.memory_space<vmem>>, vector<1x1x8x8xbf16>
    %48 = vector.shape_cast %47 : vector<1x1x8x8xbf16> to vector<8x8xbf16>
    %49 = vector.shape_cast %46 : vector<8x8xbf16> to vector<1x1x8x8xbf16>
    tpu.vector_store %arg11[%c0_28, %c0_29, %c0_30, %c0_31], %49 {strides = array<i32>} : memref<1x4x8x8xbf16, #tpu.memory_space<vmem>>, vector<1x1x8x8xbf16>,
    %50 = vector.extract_strided_slice %29 {offsets = [0, 8], sizes = [8, 8], strides = [1, 1]} : vector<8x32xf32> to vector<8x8xf32>
    %51 = arith.truncf %50 : vector<8x8xf32> to vector<8x8xbf16>
    %c0_32 = arith.constant 0 : index
    %c1 = arith.constant 1 : index
    %c0_33 = arith.constant 0 : index
    %c0_34 = arith.constant 0 : index
    %52 = vector.load %arg9[%c0_32, %c1, %c0_33, %c0_34] : memref<1x4x8x8xbf16, #tpu.memory_space<vmem>>, vector<1x1x8x8xbf16>
    %53 = vector.shape_cast %52 : vector<1x1x8x8xbf16> to vector<8x8xbf16>
    %54 = vector.shape_cast %51 : vector<8x8xbf16> to vector<1x1x8x8xbf16>
    tpu.vector_store %arg9[%c0_32, %c1, %c0_33, %c0_34], %54 {strides = array<i32>} : memref<1x4x8x8xbf16, #tpu.memory_space<vmem>>, vector<1x1x8x8xbf16>,
    %55 = vector.extract_strided_slice %34 {offsets = [0, 8], sizes = [8, 8], strides = [1, 1]} : vector<8x64xf32> to vector<8x8xf32>
    %56 = arith.truncf %55 : vector<8x8xf32> to vector<8x8xbf16>
    %c0_35 = arith.constant 0 : index
    %c1_36 = arith.constant 1 : index
    %c0_37 = arith.constant 0 : index
    %c0_38 = arith.constant 0 : index
    %57 = vector.load %arg10[%c0_35, %c1_36, %c0_37, %c0_38] : memref<1x4x8x8xbf16, #tpu.memory_space<vmem>>, vector<1x1x8x8xbf16>
    %58 = vector.shape_cast %57 : vector<1x1x8x8xbf16> to vector<8x8xbf16>
    %59 = vector.shape_cast %56 : vector<8x8xbf16> to vector<1x1x8x8xbf16>
    tpu.vector_store %arg10[%c0_35, %c1_36, %c0_37, %c0_38], %59 {strides = array<i32>} : memref<1x4x8x8xbf16, #tpu.memory_space<vmem>>, vector<1x1x8x8xbf16>,
    %60 = vector.extract_strided_slice %34 {offsets = [0, 40], sizes = [8, 8], strides = [1, 1]} : vector<8x64xf32> to vector<8x8xf32>
    %61 = arith.truncf %60 : vector<8x8xf32> to vector<8x8xbf16>
    %c0_39 = arith.constant 0 : index
    %c1_40 = arith.constant 1 : index
    %c0_41 = arith.constant 0 : index
    %c0_42 = arith.constant 0 : index
    %62 = vector.load %arg11[%c0_39, %c1_40, %c0_41, %c0_42] : memref<1x4x8x8xbf16, #tpu.memory_space<vmem>>, vector<1x1x8x8xbf16>
    %63 = vector.shape_cast %62 : vector<1x1x8x8xbf16> to vector<8x8xbf16>
    %64 = vector.shape_cast %61 : vector<8x8xbf16> to vector<1x1x8x8xbf16>
    tpu.vector_store %arg11[%c0_39, %c1_40, %c0_41, %c0_42], %64 {strides = array<i32>} : memref<1x4x8x8xbf16, #tpu.memory_space<vmem>>, vector<1x1x8x8xbf16>,
    %65 = vector.extract_strided_slice %29 {offsets = [0, 16], sizes = [8, 8], strides = [1, 1]} : vector<8x32xf32> to vector<8x8xf32>
    %66 = arith.truncf %65 : vector<8x8xf32> to vector<8x8xbf16>
    %c0_43 = arith.constant 0 : index
    %c2 = arith.constant 2 : index
    %c0_44 = arith.constant 0 : index
    %c0_45 = arith.constant 0 : index
    %67 = vector.load %arg9[%c0_43, %c2, %c0_44, %c0_45] : memref<1x4x8x8xbf16, #tpu.memory_space<vmem>>, vector<1x1x8x8xbf16>
    %68 = vector.shape_cast %67 : vector<1x1x8x8xbf16> to vector<8x8xbf16>
    %69 = vector.shape_cast %66 : vector<8x8xbf16> to vector<1x1x8x8xbf16>
    tpu.vector_store %arg9[%c0_43, %c2, %c0_44, %c0_45], %69 {strides = array<i32>} : memref<1x4x8x8xbf16, #tpu.memory_space<vmem>>, vector<1x1x8x8xbf16>,
    %70 = vector.extract_strided_slice %34 {offsets = [0, 16], sizes = [8, 8], strides = [1, 1]} : vector<8x64xf32> to vector<8x8xf32>
    %71 = arith.truncf %70 : vector<8x8xf32> to vector<8x8xbf16>
    %c0_46 = arith.constant 0 : index
    %c2_47 = arith.constant 2 : index
    %c0_48 = arith.constant 0 : index
    %c0_49 = arith.constant 0 : index
    %72 = vector.load %arg10[%c0_46, %c2_47, %c0_48, %c0_49] : memref<1x4x8x8xbf16, #tpu.memory_space<vmem>>, vector<1x1x8x8xbf16>
    %73 = vector.shape_cast %72 : vector<1x1x8x8xbf16> to vector<8x8xbf16>
    %74 = vector.shape_cast %71 : vector<8x8xbf16> to vector<1x1x8x8xbf16>
    tpu.vector_store %arg10[%c0_46, %c2_47, %c0_48, %c0_49], %74 {strides = array<i32>} : memref<1x4x8x8xbf16, #tpu.memory_space<vmem>>, vector<1x1x8x8xbf16>,
    %75 = vector.extract_strided_slice %34 {offsets = [0, 48], sizes = [8, 8], strides = [1, 1]} : vector<8x64xf32> to vector<8x8xf32>
    %76 = arith.truncf %75 : vector<8x8xf32> to vector<8x8xbf16>
    %c0_50 = arith.constant 0 : index
    %c2_51 = arith.constant 2 : index
    %c0_52 = arith.constant 0 : index
    %c0_53 = arith.constant 0 : index
    %77 = vector.load %arg11[%c0_50, %c2_51, %c0_52, %c0_53] : memref<1x4x8x8xbf16, #tpu.memory_space<vmem>>, vector<1x1x8x8xbf16>
    %78 = vector.shape_cast %77 : vector<1x1x8x8xbf16> to vector<8x8xbf16>
    %79 = vector.shape_cast %76 : vector<8x8xbf16> to vector<1x1x8x8xbf16>
    tpu.vector_store %arg11[%c0_50, %c2_51, %c0_52, %c0_53], %79 {strides = array<i32>} : memref<1x4x8x8xbf16, #tpu.memory_space<vmem>>, vector<1x1x8x8xbf16>,
    %80 = vector.extract_strided_slice %29 {offsets = [0, 24], sizes = [8, 8], strides = [1, 1]} : vector<8x32xf32> to vector<8x8xf32>
    %81 = arith.truncf %80 : vector<8x8xf32> to vector<8x8xbf16>
    %c0_54 = arith.constant 0 : index
    %c3 = arith.constant 3 : index
    %c0_55 = arith.constant 0 : index
    %c0_56 = arith.constant 0 : index
    %82 = vector.load %arg9[%c0_54, %c3, %c0_55, %c0_56] : memref<1x4x8x8xbf16, #tpu.memory_space<vmem>>, vector<1x1x8x8xbf16>
    %83 = vector.shape_cast %82 : vector<1x1x8x8xbf16> to vector<8x8xbf16>
    %84 = vector.shape_cast %81 : vector<8x8xbf16> to vector<1x1x8x8xbf16>
    tpu.vector_store %arg9[%c0_54, %c3, %c0_55, %c0_56], %84 {strides = array<i32>} : memref<1x4x8x8xbf16, #tpu.memory_space<vmem>>, vector<1x1x8x8xbf16>,
    %85 = vector.extract_strided_slice %34 {offsets = [0, 24], sizes = [8, 8], strides = [1, 1]} : vector<8x64xf32> to vector<8x8xf32>
    %86 = arith.truncf %85 : vector<8x8xf32> to vector<8x8xbf16>
    %c0_57 = arith.constant 0 : index
    %c3_58 = arith.constant 3 : index
    %c0_59 = arith.constant 0 : index
    %c0_60 = arith.constant 0 : index
    %87 = vector.load %arg10[%c0_57, %c3_58, %c0_59, %c0_60] : memref<1x4x8x8xbf16, #tpu.memory_space<vmem>>, vector<1x1x8x8xbf16>
    %88 = vector.shape_cast %87 : vector<1x1x8x8xbf16> to vector<8x8xbf16>
    %89 = vector.shape_cast %86 : vector<8x8xbf16> to vector<1x1x8x8xbf16>
    tpu.vector_store %arg10[%c0_57, %c3_58, %c0_59, %c0_60], %89 {strides = array<i32>} : memref<1x4x8x8xbf16, #tpu.memory_space<vmem>>, vector<1x1x8x8xbf16>,
    %90 = vector.extract_strided_slice %34 {offsets = [0, 56], sizes = [8, 8], strides = [1, 1]} : vector<8x64xf32> to vector<8x8xf32>
    %91 = arith.truncf %90 : vector<8x8xf32> to vector<8x8xbf16>
    %c0_61 = arith.constant 0 : index
    %c3_62 = arith.constant 3 : index
    %c0_63 = arith.constant 0 : index
    %c0_64 = arith.constant 0 : index
    %92 = vector.load %arg11[%c0_61, %c3_62, %c0_63, %c0_64] : memref<1x4x8x8xbf16, #tpu.memory_space<vmem>>, vector<1x1x8x8xbf16>
    %93 = vector.shape_cast %92 : vector<1x1x8x8xbf16> to vector<8x8xbf16>
    %94 = vector.shape_cast %91 : vector<8x8xbf16> to vector<1x1x8x8xbf16>
    tpu.vector_store %arg11[%c0_61, %c3_62, %c0_63, %c0_64], %94 {strides = array<i32>} : memref<1x4x8x8xbf16, #tpu.memory_space<vmem>>, vector<1x1x8x8xbf16>,
    return
  }
  func.func @transform_0(%arg0: i32, %arg1: i32) -> (i32, i32, i32) {
    %c0_i32 = arith.constant 0 : i32
    %c0_i32_0 = arith.constant 0 : i32
    return %arg0, %arg1, %c0_i32 : i32, i32, i32
  }
  func.func @transform_1(%arg0: i32, %arg1: i32) -> (i32, i32) {
    %c0_i32 = arith.constant 0 : i32
    %c0_i32_0 = arith.constant 0 : i32
    %c0_i32_1 = arith.constant 0 : i32
    return %c0_i32, %c0_i32_0 : i32, i32
  }
  func.func @transform_2(%arg0: i32, %arg1: i32) -> (i32, i32) {
    %c0_i32 = arith.constant 0 : i32
    %c0_i32_0 = arith.constant 0 : i32
    %c0_i32_1 = arith.constant 0 : i32
    return %c0_i32, %c0_i32_0 : i32, i32
  }
  func.func @transform_3(%arg0: i32, %arg1: i32) -> (i32, i32) {
    %c0_i32 = arith.constant 0 : i32
    %c0_i32_0 = arith.constant 0 : i32
    %c0_i32_1 = arith.constant 0 : i32
    return %c0_i32, %c0_i32_0 : i32, i32
  }
  func.func @transform_4(%arg0: i32, %arg1: i32) -> (i32, i32) {
    %c0_i32 = arith.constant 0 : i32
    %c0_i32_0 = arith.constant 0 : i32
    %c0_i32_1 = arith.constant 0 : i32
    return %c0_i32, %c0_i32_0 : i32, i32
  }
  func.func @transform_5(%arg0: i32, %arg1: i32) -> (i32, i32) {
    %c0_i32 = arith.constant 0 : i32
    %c0_i32_0 = arith.constant 0 : i32
    %c0_i32_1 = arith.constant 0 : i32
    return %c0_i32, %c0_i32_0 : i32, i32
  }
  func.func @transform_6(%arg0: i32, %arg1: i32) -> (i32, i32) {
    %c0_i32 = arith.constant 0 : i32
    %c0_i32_0 = arith.constant 0 : i32
    %c0_i32_1 = arith.constant 0 : i32
    return %c0_i32, %c0_i32_0 : i32, i32
  }
  func.func @transform_7(%arg0: i32, %arg1: i32) -> (i32, i32, i32, i32) {
    %c0_i32 = arith.constant 0 : i32
    %c0_i32_0 = arith.constant 0 : i32
    %c0_i32_1 = arith.constant 0 : i32
    return %arg0, %c0_i32, %arg1, %c0_i32_0 : i32, i32, i32, i32
  }
  func.func @transform_8(%arg0: i32, %arg1: i32) -> (i32, i32, i32, i32) {
    %c0_i32 = arith.constant 0 : i32
    %c0_i32_0 = arith.constant 0 : i32
    %c0_i32_1 = arith.constant 0 : i32
    return %arg0, %c0_i32, %arg1, %c0_i32_0 : i32, i32, i32, i32
  }
  func.func @transform_9(%arg0: i32, %arg1: i32) -> (i32, i32, i32, i32) {
    %c0_i32 = arith.constant 0 : i32
    %c0_i32_0 = arith.constant 0 : i32
    %c0_i32_1 = arith.constant 0 : i32
    return %arg0, %c0_i32, %arg1, %c0_i32_0 : i32, i32, i32, i32
  }
}

</mosaic_0001>

<bundles_post_ra>
// kernel: tpu_custom_call.1
= control target key start
LH: loop header
LB: loop body
LE: loop exit
PB: predicated region body
PF: predicated region fallthrough
CT: control target
= control target key end

     0   :  { %s1732_s0 = inlined_call_operand.hbm [shape: f32[2,8,32], index: 0, kind: input, shape index: {}]   ;;  %s1733_s1 = inlined_call_operand.vmem [shape: f32[1,32], index: 1, kind: input, shape index: {}]   ;;  %s1734_s2 = inlined_call_operand.vmem [shape: f32[1,32], index: 2, kind: input, shape index: {}]   ;;  %s1735_s3 = inlined_call_operand.hbm [shape: bf16[32,32], index: 3, kind: input, shape index: {}]   ;;  %s1736_s4 = inlined_call_operand.hbm [shape: f32[1,32], index: 4, kind: input, shape index: {}]   ;;  %s1737_s5 = inlined_call_operand.vmem [shape: bf16[32,64], index: 5, kind: input, shape index: {}]   ;;  %s1738_s6 = inlined_call_operand.vmem [shape: f32[1,64], index: 6, kind: input, shape index: {}]   ;;  %s1739_s7 = inlined_call_operand.hbm [shape: bf16[2,4,8,8], index: 7, kind: output, shape index: {0}]   ;;  %s1740_s8 = inlined_call_operand.hbm [shape: bf16[2,4,8,8], index: 8, kind: output, shape index: {1}]   ;;  %s1741_s9 = inlined_call_operand.hbm [shape: bf16[2,4,8,8], index: 9, kind: output, shape index: {2}]  }
   0x1   :  { %1751 = sst [smem:[#allocation18_spill]] %s1732_s0 }
   0x2   :  { %1752 = sst [smem:[#allocation19_spill]] %s1733_s1 }
   0x3   :  { %1753 = sst [smem:[#allocation20_spill]] %s1734_s2 }
   0x4   :  { %1754 = sst [smem:[#allocation21_spill]] %s1739_s7 }
   0x5   :  { %15 = vsyncpa [#allocation3], 0 }
   0x6   :  { %17 = vsyncpa [#allocation3 + $0x1], 0 }
   0x7   :  { %18 = vsyncpa [#allocation6], 0 }
   0x8   :  { %19 = vsyncpa [#allocation4], 0 }
   0x9   :  { %21 = vsyncpa [#allocation4 + $0x1], 0 }
   0xa   :  { %22 = vsyncpa [#allocation10], 0 }
   0xb   :  { %24 = vsyncpa [#allocation10 + $0x1], 0  ;;  %s1353_s30 = smov 0   ;;  %s1355_s10 = smov 0  }
   0xc   :  { %s1357_s11 = smov 0   ;;  %s1359_s12 = smov 0  }
   0xd   :  { %s1361_s13 = smov 0   ;;  %s1363_s14 = smov 0  }
   0xe LB: > { %1755 = sst [smem:[#allocation16_spill]] %s1262_s30  ;;  %s1384_s15 = sadd.s32 4294967295, %s1282_s14   ;;  %s1282_s14 = sphi %s1363_s14, %s30_s14   ;;  %s1278_s13 = sphi %s1361_s13, %s1782_s13   ;;  %s1274_s12 = sphi %s1359_s12, %s1781_s12   ;;  %s1270_s11 = sphi %s1357_s11, %s1780_s11   ;;  %s1266_s10 = sphi %s1355_s10, %s1779_s10   ;;  %s1262_s30 = sphi %s1353_s30, %s1778_s30  }
   0xf   : > { %s1742_s16 = sadd.s32 4294967294, %s1282_s14   ;;  %p64_p0 = scmp.ne.s32.totalorder %s1266_s10, %s1262_s30 }
  0x10   : > { %p1743_p1 = scmp.eq.s32.totalorder %s1384_s15, 0  ;;  %p222_p3 = scmp.eq.s32.totalorder %s1742_s16, 1 }
  0x11   : > { %p866_p5 = scmp.ge.s32.totalorder %s1282_s14, 1  ;;  %p285_p7 = scmp.lt.s32.totalorder %s1282_s14, 3 }
  0x12   : > { %p1395_p4 = por %p1743_p1, %p64_p0  ;;  %p1400_p6 = por %p222_p3, %p64_p0 }
  0x13   : > { %p1405_p8 = pnand %p866_p5, %p285_p7  ;;  %s1284_s20 = smov [#allocation5]  }
  0x14   : > { %s1756_s17 = scalar_select %p1395_p4, 1, 0 }
  0x15   : > { %s1757_s18 = scalar_select %p1400_p6, 1, 0 }
  0x16   : > { %s303_s21 = sshll.u32 %s1284_s20, 4  ;;  %p954_p9 = pneg %p1405_p8  ;;  %s1409_s21 = int_to_ptr.vmem [resolvable:$true] %s303_s21 }
  0x17   : > { %1758 = sst [smem:[#allocation17_spill]] %s1757_s18  ;;  %s1285_s23 = smov [#allocation7]  }
  0x18   : > { %p1416_p11 = pnand %p954_p9, %p1743_p1  ;;  %s317_s24 = sshll.u32 %s1285_s23, 4  ;;  %s1420_s24 = int_to_ptr.vmem [resolvable:$true] %s317_s24 }
  0x19   : > { %s1050_s27 = scalar_lea.hbm %s1735_s3, 256 }
  0x1a   : > { %p1051_p12 = scmp.ne.s32.totalorder %s1735_s3, %s1050_s27  ;;  %p1052_p13 = pneg %p1416_p11 }
  0x1b   : > { %p1057_p5 = scmp.lt.u32.totalorder %s1050_s27, %s1735_s3 }
  0x1c   : > { %p1053_p0 = pnand %p1052_p13, %p1051_p12 }
  0x1e   : > { %p1054_p3 = pneg %p1053_p0 }
  0x20   : > { %p1059_p7 = pnand %p1057_p5, %p1054_p3 }
  0x22   : > { %1062 = shalt.err (!%p1059_p7)
}
  0x23   : > { %s1063_s23 = scalar_lea.vmem %s1409_s21, 256  ;;  %p1071_p2 = scmp.lt.s32.totalorder %s1409_s21, %s1409_s21 }
  0x24   : > { %p1064_p9 = scmp.ne.s32.totalorder %s1409_s21, %s1063_s23  ;;  %p1072_p12 = scmp.lt.s32.totalorder %s1063_s23, %s1063_s23 }
  0x26   : > { %p1066_p10 = pnand %p1064_p9, %p1052_p13  ;;  %p1073_p0 = por %p1072_p12, %p1071_p2 }
  0x28   : > { %p1067_p1 = pneg %p1066_p10 }
  0x2a   : > { %p1074_p6 = pnand %p1073_p0, %p1067_p1 }
  0x2c   : > { %1077 = shalt.err (!%p1074_p6)
}
  0x2d   : > { %s1286_s16 = smov 64   ;;  %s1287_s25 = smov 4  }
  0x2e   : > { %957 = dma.hbm_to_vmem [thread:$0]  (!%p1416_p11), %s1735_s3, 256, %s1409_s21, [#allocation6], %s1286_s16, %s1286_s16, %s1287_s25  }
  0x2f   : > { %s1078_s20 = scalar_lea.hbm %s1736_s4, 16 }
  0x30   : > { %p1079_p2 = scmp.ne.s32.totalorder %s1736_s4, %s1078_s20  ;;  %p1085_p10 = scmp.lt.u32.totalorder %s1078_s20, %s1736_s4 }
  0x32   : > { %p1081_p1 = pnand %p1079_p2, %p1052_p13 }
  0x34   : > { %p1082_p6 = pneg %p1081_p1 }
  0x36   : > { %p1087_p3 = pnand %p1085_p10, %p1082_p6 }
  0x38   : > { %1090 = shalt.err (!%p1087_p3)
}
  0x39   : > { %s1091_s21 = scalar_lea.vmem %s1420_s24, 16  ;;  %s1098_s30 = scalar_lea.vmem %s1420_s24, 32 }
  0x3a   : > { %p1092_p5 = scmp.ne.s32.totalorder %s1420_s24, %s1091_s21  ;;  %p1099_p12 = scmp.lt.s32.totalorder %s1420_s24, %s1420_s24 }
  0x3b   : > { %p1100_p0 = scmp.lt.s32.totalorder %s1098_s30, %s1091_s21 }
  0x3c   : > { %p1094_p7 = pnand %p1092_p5, %p1052_p13 }
  0x3d   : > { %p1101_p2 = por %p1100_p0, %p1099_p12 }
  0x3e   : > { %p1095_p9 = pneg %p1094_p7 }
  0x40   : > { %p1102_p1 = pnand %p1101_p2, %p1095_p9 }
  0x42   : > { %1105 = shalt.err (!%p1102_p1)
}
  0x43   : > { %960 = dma.hbm_to_vmem [thread:$0]  (!%p1416_p11), %s1736_s4, 16, %s1420_s24, [#allocation6]  }
  0x44   : > { %s42_s16 = sadd.s32 1, %s1278_s13  ;;  %s51_s25 = sadd.s32 1, %s1270_s11 }
  0x45   : > { %p44_p13 = scmp.ge.s32.totalorder %s42_s16, 2  ;;  %p58_p6 = scmp.ne.s32.totalorder %s1270_s11, %s1266_s10 }
  0x46   : > { %p59_p10 = scmp.eq.s32.totalorder %s1282_s14, 0  ;;  %p977_p3 = scmp.lt.s32.totalorder %s1282_s14, 2 }
  0x47   : > { %s1784_s16 = smov (%p44_p13, %s42_s16), 0  ;;  %p1761_p7 = scmp.eq.s32.totalorder %s1384_s15, 1 }
  0x48   : > { %p60_p5 = por %p59_p10, %p58_p6  ;;  %s46_s26 = ssub.s32 %s1278_s13, %s1784_s16 }
  0x49   : > { %p1485_p9 = por %p1761_p7, %p58_p6  ;;  %s334_s27 = sand.u32 1, %s1270_s11  }
  0x4a   : > { %p49_p12 = scmp.eq.s32.totalorder %s46_s26, 0  ;;  %s870_s24 = sshll.u32 %s334_s27, 3 }
  0x4b   : > { %s1762_s22 = scalar_select %p1485_p9, 1, 0 }
  0x4c   : > { %s871_s28 = sshll.u32 %s1278_s13, 7  ;;  %s1763_s0 = sld [smem:[#allocation18_spill]] }
  0x4d   : > { %s1494_s29 = scalar_select %p49_p12, %s1270_s11, %s51_s25  }
  0x4e   : > { %s338_s30 = scalar_lea.vmem [#allocation2], %s870_s24  ;;  %p1503_p11 = pnand %p977_p3, %p60_p5 }
  0x4f   : > { %s346_s7 = sshll.u32 %s338_s30, 4  ;;  %s335_s25 = scalar_lea.sflag [#allocation3], %s334_s27  ;;  %s1507_s7 = int_to_ptr.vmem [resolvable:$true] %s346_s7 }
  0x50   : > { %p1108_p2 = pneg %p1503_p11 }
  0x52   : > { %s1499_s21 = scalar_lea.hbm %s1763_s0, %s871_s28  ;;  %s1111_s20 = scalar_lea.hbm %s1763_s0, 256 }
  0x53   : > { %s1106_s26 = scalar_lea.hbm %s1499_s21, 128  ;;  %p1112_p6 = scmp.lt.u32.totalorder %s1499_s21, %s1763_s0 }
  0x54   : > { %p1107_p0 = scmp.ne.s32.totalorder %s1499_s21, %s1106_s26  ;;  %p1113_p10 = scmp.lt.u32.totalorder %s1111_s20, %s1106_s26 }
  0x55   : > { %p1115_p5 = scmp.lt.u32.totalorder %s1106_s26, %s1499_s21 }
  0x56   : > { %p1109_p1 = pnand %p1108_p2, %p1107_p0  ;;  %p1114_p3 = por %p1113_p10, %p1112_p6 }
  0x58   : > { %p1110_p13 = pneg %p1109_p1  ;;  %p1116_p7 = por %p1115_p5, %p1114_p3 }
  0x5a   : > { %p1117_p12 = pnand %p1116_p7, %p1110_p13 }
  0x5c   : > { %1120 = shalt.err (!%p1117_p12)
}
  0x5d   : > { %s1121_s27 = scalar_lea.vmem %s1507_s7, 128  ;;  %s1288_s24 = smov [#allocation2]  }
  0x5e   : > { %p1122_p0 = scmp.ne.s32.totalorder %s1507_s7, %s1121_s27  ;;  %s1126_s28 = sshll.u32 %s1288_s24, 4  ;;  %s1127_s28 = int_to_ptr.vmem [resolvable:$false] %s1126_s28 }
  0x5f   : > { %s1128_s23 = scalar_lea.vmem %s1127_s28, 256  ;;  %p1129_p4 = scmp.lt.s32.totalorder %s1507_s7, %s1127_s28 }
  0x60   : > { %p1124_p1 = pnand %p1122_p0, %p1108_p2  ;;  %p1130_p6 = scmp.lt.s32.totalorder %s1128_s23, %s1121_s27 }
  0x62   : > { %p1125_p9 = pneg %p1124_p1  ;;  %p1131_p10 = por %p1130_p6, %p1129_p4 }
  0x64   : > { %p1132_p3 = pnand %p1131_p10, %p1125_p9 }
  0x66   : > { %1135 = shalt.err (!%p1132_p3)
}
  0x67   : > { %964 = dma.hbm_to_vmem [thread:$0]  (!%p1503_p11), %s1499_s21, 128, %s1507_s7, %s335_s25  }
  0x68   : > { %355 = sbr.rel (%p1405_p8) target bundleno = 835 (0x343), region = 48  ;;  %s1537_s26 = sand.u32 (!%p1405_p8), 1, %s1266_s10  }
  0x69   : > { %s873_s20 = sshll.u32 (!%p1405_p8), %s1537_s26, 3  ;;  %s358_s30 = scalar_lea.sflag (!%p1405_p8), [#allocation3], %s1537_s26 }
  0x6a   : > { %s361_s27 = scalar_lea.vmem (!%p1405_p8), [#allocation2], %s873_s20  ;;  %p1765_p4 = scmp.ne.s32.totalorder (!%p1405_p8), %s1756_s17, 0 }
  0x6f   : > { %1245 = dma.done.wait (%p1765_p4), %s358_s30, 128  }
  0x70   : > { %1247 = vsyncadd (%p1765_p4), %s358_s30, 4294967168  ;;  %p1766_p9 = scmp.eq.s32.totalorder %s1384_s15, 0 }
  0x72   : > { %1249 = dma.done.wait (%p1766_p9), [#allocation6], 272   ;;  %p1767_p11 = pmov %p1766_p9 }
  0x73   : > { %vm418_vm0 = vcmask 261120   ;;  %v415_v0 = vld [vmem:[%s361_s27] sm:$0xff]  ;;  %v1044_v7 = vld [vmem:[#allocation5] sm:$0xff]   ;;  %v1289_v9 = vmov 0.0   ;;  %v1046_v10 = vld [vmem:[#allocation5 + $0x8] sm:$0xff]   ;;  %vm1290_vm1 = vmmov 0  }
  0x74   : > { %1251 = vsyncadd (%p1767_p11), [#allocation6], 4294967024  ;;  %v419_v1 = vsel %vm418_vm0, %v415_v0, 0.0  ;;  %v1045_v8 = vld [vmem:[%s1737_s5] sm:$0xff]   ;;  %922 = vmatprep.subr.bf16.mxu0 %v1289_v9  ;;  %930 = vmatprep.subr.bf16.mxu1 %v1289_v9  ;;  %v1047_v11 = vld [vmem:[%s1737_s5 + $0x8] sm:$0xff]   ;;  %s1768_s1 = sld [smem:[#allocation19_spill]] }
  0x75   : > { %420 = vadd.xlane.f32.xlu0 %v419_v1  ;;  %923 = vmatpush3.bf16.msra.mxu0 %v1044_v7  ;;  %s1769_s2 = sld [smem:[#allocation20_spill]]  ;;  %s1566_s23 = sshll.u32 %s1537_s26, 4  ;;  %v881_v22 = vld [vmem:[#allocation7] ss:$0 sm:$0xff]  ;;  %vm578_vm2 = vcmask 60416  }
  0x76   : > { %931 = vmatpush3.bf16.msra.mxu1 %v1045_v8  ;;  %924 = vmatprep.subr.bf16.mxu0 %v1289_v9  ;;  %v885_v23 = vld [vmem:[%s1738_s6] ss:$0 sm:$0xff]  ;;  %s1572_s27 = scalar_lea.vmem [#allocation8], %s1566_s23  ;;  %s1291_s17 = smov 104  }
  0x77   : > { %932 = vmatprep.subr.bf16.mxu1 %v1289_v9  ;;  %926 = vmatprep.mubr.msk.bf16.mxu0 %vm1290_vm1, %v1289_v9  ;;  %s1292_s19 = smov 120   ;;  %s406_s21 = scalar_lea.vmem [#allocation9], %s1566_s23 }
  0x78   : > { %934 = vmatprep.mubr.msk.bf16.mxu1 %vm1290_vm1, %v1289_v9  ;;  %s1293_s7 = smov 72   ;;  %s1294_s18 = smov 112  }
  0x79   : > { %925 = vmatpush3.bf16.msra.mxu0 %v1046_v10  ;;  %s1295_s25 = smov 96   ;;  %s1296_s24 = smov 88  }
  0x7a   : > { %933 = vmatpush3.bf16.msra.mxu1 %v1047_v11  ;;  %v879_v16 = vld [vmem:[%s1768_s1] ss:$0 sm:$0xff]  ;;  %s1297_s28 = smov 80   ;;  %s679_s20 = sshll.u32 %s406_s21, 4  ;;  %s1582_s20 = int_to_ptr.vmem [resolvable:$true] %s679_s20 }
  0x7b   : > { %v880_v18 = vld [vmem:[%s1769_s2] ss:$0 sm:$0xff]  ;;  %s642_s30 = sand.u32 1, %s1384_s15   ;;  %s1580_s0 = sshll.u32 %s1274_s12, 8 }
  0x7c   : > { %s1593_s15 = scalar_lea.vmem [#allocation11], %s1566_s23  ;;  %s1598_s12 = scalar_lea.sflag [#allocation10], %s642_s30 }
  0x7d   : > { %p1770_p2 = scmp.ne.s32.totalorder %s1762_s22, 0 }
 0x102   : > { %v421_v2 = vpop.xlane.xlu0 %420 }
 0x103   : > { %v423_v3 = vmul.f32 0.03125, %v421_v2 }
 0x105   : > { %v424_v4 = vsub.f32 %v415_v0, %v423_v3 }
 0x107   : > { %v425_v5 = vmul.f32 %v424_v4, %v424_v4 }
 0x109   : > { %v426_v6 = vsel %vm418_vm0, %v425_v5, 0.0 }
 0x10a   : > { %427 = vadd.xlane.f32.xlu0 %v426_v6 }
 0x197   : > { %v428_v12 = vpop.xlane.xlu0 %427 }
 0x198   : > { %v429_v13 = vmul.f32 0.03125, %v428_v12 }
 0x19a   : > { %v430_v14 = vadd.f32 1e-12, %v429_v13 }
 0x19c   : > { %1048 = vrsqrt.f32 %v430_v14 }
 0x1a6   : > { %v1049_v15 = vpop.eup %1048 }
 0x1a7   : > { %v432_v17 = vmul.f32 %v1049_v15, %v424_v4 }
 0x1a9   : > { %v439_v19 = vmul.f32 %v879_v16, %v432_v17 }
 0x1ab   : > { %v446_v20 = vadd.f32 %v880_v18, %v439_v19 }
 0x1ad   : > { %v447_v21 = vpack.c.bf16 %v446_v20, %v446_v20 }
 0x1af   : > { %927 = vmatmul.mubr.msk.bf16.vlgmr.msra.gmra.mrb[0].mxu0 %vm418_vm0, %v447_v21  ;;  %935 = vmatmul.mubr.msk.bf16.vlgmr.msra.gmra.mrb[0].mxu1 %vm418_vm0, %v447_v21 }
 0x282   : > { %v508_v24 = vpop.f32.mrb[0].mxu0  ;;  %v571_v25 = vpop.f32.mrb[0].mxu1 }
 0x283   : > { %v509_v26 = vadd.f32 %v881_v22, %v508_v24  ;;  %v572_v27 = vadd.f32 %v885_v23, %v571_v25  ;;  %v928_v28 = vpop.f32.mrb[1].mxu0  ;;  %v936_v29 = vpop.f32.mrb[1].mxu1 }
 0x284   : > { %v511_v30 = vpop.f32.mrb[2].mxu0  ;;  %v574_v31 = vpop.f32.mrb[2].mxu1 }
 0x285   : > { %v577_v32 = vpack.c.bf16 %v509_v26, %v509_v26  ;;  %v580_v33 = vpack.c.bf16 %v572_v27, %v572_v27  ;;  %v929_v34 = vpop.f32.mrb[3].mxu0  ;;  %v937_v35 = vpop.f32.mrb[3].mxu1 }
 0x287   : > { %579 = vst.msk [vmem:[%s1572_s27] sm:$0xf] %vm578_vm2, %v577_v32  ;;  %627 = vrot.lane.b32.xlu0 %v580_v33, %s1291_s17  ;;  %597 = vrot.lane.b32.xlu1 %v580_v33, %s1292_s19  ;;  %581 = vst.msk [vmem:[%s406_s21] sm:$0xf] %vm578_vm2, %v580_v33 }
 0x28b   : > { %632 = vrot.lane.b32.xlu0 %v580_v33, %s1293_s7  ;;  %612 = vrot.lane.b32.xlu1 %v580_v33, %s1294_s18 }
 0x28f   : > { %585 = vrot.lane.b32.xlu1 %v580_v33, %s1295_s25  ;;  %s1298_s25 = smov [#allocation9]  }
 0x293   : > { %592 = vrot.lane.b32.xlu1 %v577_v32, %s1292_s19 }
 0x297   : > { %602 = vrot.lane.b32.xlu1 %v580_v33, %s1296_s24  ;;  %s1140_s24 = sshll.u32 %s1298_s25, 4  ;;  %s1141_s24 = int_to_ptr.vmem [resolvable:$false] %s1140_s24 }
 0x298   : > { %p1143_p7 = scmp.lt.s32.totalorder %s1582_s20, %s1141_s24 }
 0x29b   : > { %607 = vrot.lane.b32.xlu1 %v577_v32, %s1294_s18  ;;  %s1136_s18 = scalar_lea.vmem %s1582_s20, 256 }
 0x29c   : > { %p1137_p8 = scmp.ne.s32.totalorder %s1582_s20, %s1136_s18 }
 0x29e   : > { %p1138_p13 = pnand %p1137_p8, %p1770_p2 }
 0x29f   : > { %617 = vrot.lane.b32.xlu1 %v580_v33, %s1297_s28  ;;  %s1142_s28 = scalar_lea.vmem %s1141_s24, 512 }
 0x2a0   : > { %p1139_p5 = pneg %p1138_p13  ;;  %p1144_p12 = scmp.lt.s32.totalorder %s1142_s28, %s1136_s18 }
 0x2a2   : > { %p1145_p0 = por %p1144_p12, %p1143_p7 }
 0x2a3   : > { %622 = vrot.lane.b32.xlu1 %v577_v32, %s1291_s17  ;;  %s1590_s17 = scalar_lea.hbm %s1740_s8, %s1580_s0 }
 0x2a4   : > { %p1146_p1 = pnand %p1145_p0, %p1139_p5 }
 0x2f9   : > { %v628_v36 = vpop.permute.xlu0 %627  ;;  %v598_v37 = vpop.permute.xlu1 %597 }
 0x2fa   : > { %898 = vst.msk [vmem:[%s406_s21 + $0xc] sm:$0xf] %vm578_vm2, %v628_v36  ;;  %892 = vst.msk [vmem:[%s406_s21 + $0x4] sm:$0xf] %vm578_vm2, %v598_v37 }
 0x2fd   : > { %v633_v38 = vpop.permute.xlu0 %632  ;;  %v613_v39 = vpop.permute.xlu1 %612 }
 0x2fe   : > { %899 = vst.msk [vmem:[%s1593_s15 + $0xc] sm:$0xf] %vm578_vm2, %v633_v38  ;;  %895 = vst.msk [vmem:[%s406_s21 + $0x8] sm:$0xf] %vm578_vm2, %v613_v39 }
 0x2ff   : > { %1149 = shalt.err (!%p1146_p1)
}
 0x300   : > { %s1150_s23 = scalar_lea.hbm %s1590_s17, 256  ;;  %s1154_s19 = scalar_lea.hbm %s1740_s8, 512 }
 0x301   : > { %p1151_p6 = scmp.ne.s32.totalorder %s1590_s17, %s1150_s23  ;;  %p1155_p4 = scmp.lt.u32.totalorder %s1590_s17, %s1740_s8 }
 0x302   : > { %p1156_p9 = scmp.lt.u32.totalorder %s1154_s19, %s1150_s23  ;;  %p1158_p8 = scmp.lt.u32.totalorder %s1150_s23, %s1590_s17 }
 0x303   : > { %p1152_p10 = pnand %p1151_p6, %p1770_p2 }
 0x304   : > { %p1157_p11 = por %p1156_p9, %p1155_p4 }
 0x305   : > { %p1153_p3 = pneg %p1152_p10 }
 0x306   : > { %p1159_p13 = por %p1158_p8, %p1157_p11 }
 0x308   : > { %p1160_p5 = pnand %p1159_p13, %p1153_p3 }
 0x30a   : > { %1163 = shalt.err (!%p1160_p5)
}
 0x30b   : > { %s1749_s18 = smov 64   ;;  %s1300_s24 = smov 4   ;;  %v586_v40 = vpop.permute.xlu1 %585 }
 0x30c   : > { %949 = dma.vmem_to_hbm [thread:$0]  (%p1770_p2), %s1582_s20, 256, %s1590_s17, %s1598_s12, %s1749_s18, %s1749_s18, %s1300_s24  }
 0x30d   : > { %588 = vst.msk [vmem:[%s1593_s15] sm:$0xf] %vm578_vm2, %v586_v40  ;;  %s696_s28 = sshll.u32 %s1593_s15, 4  ;;  %s662_s23 = sshll.u32 %s1572_s27, 4  ;;  %s1635_s28 = int_to_ptr.vmem [resolvable:$true] %s696_s28  ;;  %s1643_s23 = int_to_ptr.vmem [resolvable:$true] %s662_s23 }
 0x30e   : > { %s1641_s20 = scalar_lea.hbm %s1741_s9, %s1580_s0  ;;  %s1164_s17 = scalar_lea.vmem %s1635_s28, 256 }
 0x30f   : > { %v593_v41 = vpop.permute.xlu1 %592  ;;  %p1165_p7 = scmp.ne.s32.totalorder %s1635_s28, %s1164_s17  ;;  %s1301_s19 = smov [#allocation11]  }
 0x310   : > { %891 = vst.msk [vmem:[%s1572_s27 + $0x4] sm:$0xf] %vm578_vm2, %v593_v41  ;;  %s1168_s7 = sshll.u32 %s1301_s19, 4  ;;  %s1169_s7 = int_to_ptr.vmem [resolvable:$false] %s1168_s7 }
 0x311   : > { %p1166_p12 = pnand %p1165_p7, %p1770_p2  ;;  %s1170_s25 = scalar_lea.vmem %s1169_s7, 512 }
 0x312   : > { %p1171_p1 = scmp.lt.s32.totalorder %s1635_s28, %s1169_s7  ;;  %p1172_p6 = scmp.lt.s32.totalorder %s1170_s25, %s1164_s17 }
 0x313   : > { %v603_v42 = vpop.permute.xlu1 %602  ;;  %p1167_p0 = pneg %p1166_p12 }
 0x314   : > { %893 = vst.msk [vmem:[%s1593_s15 + $0x4] sm:$0xf] %vm578_vm2, %v603_v42  ;;  %p1173_p10 = por %p1172_p6, %p1171_p1 }
 0x316   : > { %p1174_p3 = pnand %p1173_p10, %p1167_p0 }
 0x317   : > { %v608_v43 = vpop.permute.xlu1 %607 }
 0x318   : > { %894 = vst.msk [vmem:[%s1572_s27 + $0x8] sm:$0xf] %vm578_vm2, %v608_v43 }
 0x31b   : > { %v618_v44 = vpop.permute.xlu1 %617 }
 0x31c   : > { %896 = vst.msk [vmem:[%s1593_s15 + $0x8] sm:$0xf] %vm578_vm2, %v618_v44 }
 0x31d   : > { %1177 = shalt.err (!%p1174_p3)
}
 0x31e   : > { %s1178_s15 = scalar_lea.hbm %s1641_s20, 256  ;;  %s1182_s19 = scalar_lea.hbm %s1741_s9, 512 }
 0x31f   : > { %p1179_p4 = scmp.ne.s32.totalorder %s1641_s20, %s1178_s15  ;;  %p1183_p8 = scmp.lt.u32.totalorder %s1641_s20, %s1741_s9 }
 0x320   : > { %p1184_p13 = scmp.lt.u32.totalorder %s1182_s19, %s1178_s15  ;;  %p1186_p7 = scmp.lt.u32.totalorder %s1178_s15, %s1641_s20 }
 0x321   : > { %p1180_p9 = pnand %p1179_p4, %p1770_p2 }
 0x322   : > { %p1185_p5 = por %p1184_p13, %p1183_p8 }
 0x323   : > { %p1181_p11 = pneg %p1180_p9 }
 0x324   : > { %p1187_p12 = por %p1186_p7, %p1185_p5 }
 0x326   : > { %p1188_p0 = pnand %p1187_p12, %p1181_p11 }
 0x328   : > { %1191 = shalt.err (!%p1188_p0)
}
 0x329   : > { %s1771_s17 = smov 64   ;;  %s1772_s15 = sld [smem:[#allocation21_spill]]  ;;  %v623_v45 = vpop.permute.xlu1 %622 }
 0x32a   : > { %950 = dma.vmem_to_hbm [thread:$0]  (%p1770_p2), %s1635_s28, 256, %s1641_s20, %s1598_s12, %s1771_s17, %s1771_s17, %s1300_s24  }
 0x32b   : > { %897 = vst.msk [vmem:[%s1572_s27 + $0xc] sm:$0xf] %vm578_vm2, %v623_v45  ;;  %s638_s30 = scalar_lea.sflag [#allocation4], %s1537_s26  ;;  %s1192_s19 = scalar_lea.vmem %s1643_s23, 256 }
 0x32c   : > { %p1193_p1 = scmp.ne.s32.totalorder %s1643_s23, %s1192_s19  ;;  %s1302_s7 = smov [#allocation8]  }
 0x32d   : > { %s1196_s1 = sshll.u32 %s1302_s7, 4  ;;  %s1197_s1 = int_to_ptr.vmem [resolvable:$false] %s1196_s1 }
 0x32e   : > { %p1194_p6 = pnand %p1193_p1, %p1770_p2  ;;  %s1198_s2 = scalar_lea.vmem %s1197_s1, 512 }
 0x32f   : > { %s1676_s21 = scalar_lea.hbm %s1772_s15, %s1580_s0  ;;  %p1199_p3 = scmp.lt.s32.totalorder %s1643_s23, %s1197_s1 }
 0x330   : > { %p1195_p10 = pneg %p1194_p6  ;;  %p1200_p4 = scmp.lt.s32.totalorder %s1198_s2, %s1192_s19 }
 0x332   : > { %p1201_p9 = por %p1200_p4, %p1199_p3 }
 0x334   : > { %p1202_p11 = pnand %p1201_p9, %p1195_p10 }
 0x336   : > { %1205 = shalt.err (!%p1202_p11)
}
 0x337   : > { %s1206_s0 = scalar_lea.hbm %s1676_s21, 256  ;;  %s1210_s28 = scalar_lea.hbm %s1772_s15, 512 }
 0x338   : > { %p1207_p8 = scmp.ne.s32.totalorder %s1676_s21, %s1206_s0  ;;  %p1211_p7 = scmp.lt.u32.totalorder %s1676_s21, %s1772_s15 }
 0x339   : > { %p1212_p12 = scmp.lt.u32.totalorder %s1210_s28, %s1206_s0  ;;  %p1214_p1 = scmp.lt.u32.totalorder %s1206_s0, %s1676_s21 }
 0x33a   : > { %p1208_p13 = pnand %p1207_p8, %p1770_p2 }
 0x33b   : > { %p1213_p0 = por %p1212_p12, %p1211_p7 }
 0x33c   : > { %p1209_p5 = pneg %p1208_p13 }
 0x33d   : > { %p1215_p6 = por %p1214_p1, %p1213_p0 }
 0x33f   : > { %p1216_p10 = pnand %p1215_p6, %p1209_p5 }
 0x341   : > { %1219 = shalt.err (!%p1216_p10)
}
 0x342   : > { %948 = dma.vmem_to_hbm [thread:$0]  (%p1770_p2), %s1643_s23, 256, %s1676_s21, %s638_s30, %s1771_s17, %s1771_s17, %s1300_s24  }
 0x343 PF: > { %s1773_s2 = sld [smem:[#allocation16_spill]]  ;;  %s1774_s18 = sld [smem:[#allocation17_spill]] }
 0x344   : > { %p1776_p4 = scmp.ge.s32.totalorder %s1282_s14, 2 }
 0x349   : > { %s711_s25 = sand.u32 1, %s1773_s2   ;;  %p1775_p3 = scmp.ne.s32.totalorder %s1774_s18, 0 }
 0x34a   : > { %s712_s19 = scalar_lea.sflag [#allocation4], %s711_s25 }
 0x34b   : > { %p966_p9 = pnand %p1776_p4, %p1775_p3 }
 0x34d   : > { %1253 = dma.done.wait (!%p966_p9), %s712_s19, 256  }
 0x34e   : > { %1255 = vsyncadd (!%p966_p9), %s712_s19, 4294967040  ;;  %s1777_s22 = sadd.s32 4294967294, %s1282_s14  }
 0x34f   : > { %s720_s7 = sand.u32 1, %s1777_s22  }
 0x350   : > { %s721_s0 = scalar_lea.sflag [#allocation10], %s720_s7 }
 0x351   : > { %1257 = dma.done.wait (!%p966_p9), %s721_s0, 512  }
 0x352   : > { %1259 = vsyncadd (!%p966_p9), %s721_s0, 4294966784  ;;  %s30_s14 = sadd.s32 1, %s1282_s14   ;;  %s1778_s30 = smov %s1266_s10 }
 0x353   : > { %p27_p2 = scmp.ge.s32.totalorder %s30_s14, 4   ;;  %s1779_s10 = smov %s1270_s11 }
 0x354   : > { %s1780_s11 = smov %s1494_s29  ;;  %s1781_s12 = smov %s1278_s13 }
 0x355   : > { %s1782_s13 = smov %s1784_s16  ;;  %29 = sbr.rel (!%p27_p2) target bundleno = 14 (0xe), region = 142 }
 0x35c   :  { %735 = vsyncpa [#allocation3], 1 }
 0x35d   :  { %737 = vsyncpa [#allocation3 + $0x1], 1 }
 0x35e   :  { %738 = vsyncpa [#allocation6], 1 }
 0x35f   :  { %739 = vsyncpa [#allocation4], 1 }
 0x360   :  { %741 = vsyncpa [#allocation4 + $0x1], 1 }
 0x361   :  { %742 = vsyncpa [#allocation10], 1 }
 0x362   :  { %744 = vsyncpa [#allocation10 + $0x1], 1 }

</bundles_post_ra>
